<compile_context>
chip_gen: v7x
topology: tpu7x:2x2x1
jax: 0.10.0
libtpu: 0.0.40
codegen_flags: <defaults>
</compile_context>

<pallas_src>
import functools

import jax
import jax.numpy as jnp
from jax.experimental import pallas as pl
from jax.experimental.pallas import tpu as pltpu


def _round_up(v, m):
    return ((v + m - 1) // m) * m


def _ipow(x, n):
    """x ** n for static non-negative integer n via a multiply chain (VPU only)."""
    if n == 0:
        return jnp.ones_like(x)
    acc = None
    base = x
    while n:
        if n & 1:
            acc = base if acc is None else acc * base
        n >>= 1
        if n:
            base = base * base
    return acc


def _focal_math(pt, w, *, gamma, eps):
    """Lane-dense focal-loss math.

    pt, w: (rows, 128) f32.  Ignored targets and padded rows carry w == 0,
    which zeroes both the loss and the 'mean' denominator, so no in-kernel
    masking is needed.
    """
    focal = jnp.maximum(1.0 - pt, 0.0)        # clamp: bf16/unnormalized inputs
    nll = -jnp.log(eps + pt)
    g = float(gamma)
    if g == int(g) and 0 <= int(g) <= 16:
        fp = _ipow(focal, int(g))             # VPU multiplies, no EUP pow
    else:
        fp = jnp.power(focal, g)              # non-integer gamma: keep pow
    return w * fp * nll


def _focal_reduce_kernel(pt_ref, w_ref, part_ref, *, gamma, eps):
    """Per-tile partial sums packed into one lane-dense (1, 1, 128) block."""
    pt = pt_ref[...].astype(jnp.float32)      # bf16 or f32 in HBM -> f32 here
    w = w_ref[...]
    loss = _focal_math(pt, w, gamma=gamma, eps=eps)
    lsum = jnp.sum(loss)
    dsum = jnp.sum(w)                         # = sum((~mask) * class_weight)
    lane = jax.lax.broadcasted_iota(jnp.int32, (1, 1, 128), 2)
    part_ref[...] = jnp.where(lane == 0, lsum, jnp.where(lane == 1, dsum, 0.0))


def _focal_none_kernel(pt_ref, w_ref, loss_ref, *, gamma, eps):
    """Per-sample loss, lane-dense (tile_rows, 128) output."""
    pt = pt_ref[...].astype(jnp.float32)
    loss_ref[...] = _focal_math(pt, w_ref[...], gamma=gamma, eps=eps)


def _pick_tile_rows(r_rows, bytes_per_row, *, target_step_bytes=8 << 20):
    """Rows-of-128-samples per grid step, sized by bytes not by row count.

    ~8 MiB/step keeps the ~0.35 us per-step grid overhead negligible even at
    v7x HBM bandwidth; double-buffered this stays well inside every
    generation's VMEM once vmem_limit_bytes is raised explicitly.
    """
    tr = max(8, (target_step_bytes // max(bytes_per_row, 1)) // 8 * 8)
    if tr >= r_rows:
        if r_rows > 8:
            # Split so the "parallel" grid axis has >= 2 blocks and v7x can
            # shard across both TensorCores.
            tr = _round_up(-(-r_rows // 2), 8)
        else:
            tr = 8
    return int(tr)


def focal_loss(x, target, class_weights=None, *, gamma=2.0, reduction="mean",
               ignore_index=-100, eps=1e-16, tile_rows=None):
    """x: (..., C) probabilities (f32 or bf16); target: (...) int class indices."""
    if reduction not in ("mean", "sum", "none"):
        raise NotImplementedError("Reduction {} not implemented.".format(reduction))

    # TODO(synk): torch forward's runtime value-range assert on x (0 <= x <= 1)
    # has no in-graph equivalent; it is skipped here.

    x = jnp.asarray(x)
    target = jnp.asarray(target)

    # Binary case (torch `_process_preds`): no class dim -> stack [1-x, x].
    if x.ndim == target.ndim:
        x = jnp.stack([1.0 - x, x], axis=-1)

    c = x.shape[-1]
    x2 = x.reshape(-1, c)
    t_flat = target.reshape(-1).astype(jnp.int32)
    n = x2.shape[0]

    not_ignored = t_flat != ignore_index
    t_eff = jnp.where(not_ignored, t_flat, 0)

    # pt = x[i, t_i]: the single pass over the (N, C) tensor happens in the
    # wrapper (plain XLA gather); the kernel only streams lane-dense per-sample
    # data, so its HBM traffic no longer scales with C.
    pt = jnp.take_along_axis(x2, t_eff[:, None], axis=-1)[:, 0]
    pt = jnp.where(not_ignored, pt, 0).astype(x2.dtype)

    # Per-sample rescaling weight with the ignore mask folded in: w == 0 zeroes
    # both the loss and the 'mean' denominator for ignored (and padded) rows.
    if class_weights is None:
        w = not_ignored.astype(jnp.float32)
    else:
        cw = jnp.asarray(class_weights, dtype=jnp.float32).reshape(-1)
        w = jnp.where(not_ignored, cw[t_eff], 0.0)

    # Lane-dense layout: rows of 128 samples.
    r0 = -(-n // 128)
    bytes_per_row = 128 * (pt.dtype.itemsize + 4)
    if reduction == "none":
        bytes_per_row += 128 * 4              # lane-dense per-sample output
    if tile_rows is not None:
        tr = max(8, _round_up(int(tile_rows), 8))
    else:
        tr = _pick_tile_rows(r0, bytes_per_row)
    r = _round_up(max(r0, 1), tr)
    num_tiles = r // tr
    n_pad = r * 128

    # Only the tiny (N,) vectors are padded; the (N, C) tensor is never copied.
    if n_pad != n:
        pad = n_pad - n
        pt = jnp.concatenate([pt, jnp.zeros((pad,), pt.dtype)])
        w = jnp.concatenate([w, jnp.zeros((pad,), jnp.float32)])
    pt2 = pt.reshape(r, 128)
    w2 = w.reshape(r, 128)

    in_specs = [
        pl.BlockSpec((tr, 128), lambda i: (i, 0)),   # pt tile
        pl.BlockSpec((tr, 128), lambda i: (i, 0)),   # w tile
    ]
    # Independent output blocks per tile -> the grid axis is truly parallel
    # (v7x shards across both TensorCores; neutral on v5e/v6e).  Explicit VMEM
    # limit so large byte-sized tiles don't trip the 16/32 MiB scoped defaults.
    params = pltpu.CompilerParams(
        dimension_semantics=("parallel",),
        vmem_limit_bytes=48 * 1024 * 1024,
    )

    if reduction == "none":
        kern = functools.partial(_focal_none_kernel, gamma=float(gamma),
                                 eps=float(eps))
        loss = pl.pallas_call(
            kern,
            out_shape=jax.ShapeDtypeStruct((r, 128), jnp.float32),
            grid_spec=pltpu.PrefetchScalarGridSpec(
                num_scalar_prefetch=0,
                grid=(num_tiles,),
                in_specs=in_specs,
                out_specs=pl.BlockSpec((tr, 128), lambda i: (i, 0)),
            ),
            compiler_params=params,
        )(pt2, w2)
        return loss.reshape(-1)[:n]

    kern = functools.partial(_focal_reduce_kernel, gamma=float(gamma),
                             eps=float(eps))
    parts = pl.pallas_call(
        kern,
        out_shape=jax.ShapeDtypeStruct((num_tiles, 1, 128), jnp.float32),
        grid_spec=pltpu.PrefetchScalarGridSpec(
            num_scalar_prefetch=0,
            grid=(num_tiles,),
            in_specs=in_specs,
            out_specs=pl.BlockSpec((1, 1, 128), lambda i: (i, 0, 0)),
        ),
        compiler_params=params,
    )(pt2, w2)

    lsum = jnp.sum(parts[:, 0, 0])
    dsum = jnp.sum(parts[:, 0, 1])
    if reduction == "mean":
        # NOTE: dsum == 0 (every target ignored / all weights zero) yields
        # NaN/Inf, exactly matching the PyTorch reference behavior.
        return lsum / dsum
    return lsum  # 'sum'


def _reference_focal_loss(x, target, class_weights, gamma, ignore_index, eps,
                          reduction="mean"):
    """Pure-JAX port of the PyTorch forward, for verification."""
    c = x.shape[-1]
    x2 = x.reshape(-1, c).astype(jnp.float32)
    t = target.reshape(-1)
    mask = t == ignore_index
    t_eff = t * (t != ignore_index)
    onehot = jax.nn.one_hot(t_eff, c, dtype=jnp.float32)
    if class_weights is None:
        w = jnp.ones((t.shape[0],), jnp.float32)
    else:
        w = jnp.sum(onehot * jnp.asarray(class_weights,
                                         dtype=jnp.float32).reshape(1, c), axis=-1)
    pt = jnp.sum(onehot * x2, axis=-1) * (~mask)
    focal = 1.0 - pt
    nll = -jnp.log(eps + pt)
    nll = jnp.where(mask, 0.0, nll)
    loss = w * focal ** gamma * nll
    if reduction == "mean":
        return loss.sum() / ((~mask) * w).sum()
    elif reduction == "sum":
        return loss.sum()
    return loss


if __name__ == "__main__":
    key = jax.random.PRNGKey(0)
    k1, k2, k3, k4, k5, k6 = jax.random.split(key, 6)

    B, S, C = 2, 150, 16          # N = 300 flattened samples (exercises padding)
    GAMMA = 2.0
    EPS = 1e-16
    IGNORE = -100

    logits = jax.random.normal(k1, (B, S, C), jnp.float32)
    x = jax.nn.softmax(logits, axis=-1)
    target = jax.random.randint(k2, (B, S), 0, C, jnp.int32)
    flat_idx = jnp.arange(B * S).reshape(B, S)
    target = jnp.where(flat_idx % 7 == 3, IGNORE, target)
    class_weights = jnp.linspace(0.5, 1.5, C, dtype=jnp.float32)

    # 1) mean, f32, auto tile sizing (single small tile)
    out = focal_loss(x, target, class_weights, gamma=GAMMA, reduction="mean",
                     ignore_index=IGNORE, eps=EPS)
    out = jax.block_until_ready(out)
    ref = _reference_focal_loss(x, target, class_weights, GAMMA, IGNORE, EPS,
                                reduction="mean")
    assert jnp.allclose(out, ref, rtol=1e-5, atol=1e-5), (out, ref)

    # 2) mean, forced multi-tile grid (per-tile partial sums, parallel axis)
    logits_l = jax.random.normal(k3, (2, 1500, C), jnp.float32)
    x_l = jax.nn.softmax(logits_l, axis=-1)
    target_l = jax.random.randint(k4, (2, 1500), 0, C, jnp.int32)
    target_l = jnp.where(jnp.arange(2 * 1500).reshape(2, 1500) % 5 == 1,
                         IGNORE, target_l)
    out_mt = focal_loss(x_l, target_l, class_weights, gamma=GAMMA,
                        reduction="mean", ignore_index=IGNORE, eps=EPS,
                        tile_rows=8)
    out_mt = jax.block_until_ready(out_mt)
    ref_mt = _reference_focal_loss(x_l, target_l, class_weights, GAMMA, IGNORE,
                                   EPS, reduction="mean")
    assert jnp.allclose(out_mt, ref_mt, rtol=1e-5, atol=1e-5), (out_mt, ref_mt)

    # 3) sum reduction
    out_sum = focal_loss(x, target, class_weights, gamma=GAMMA, reduction="sum",
                         ignore_index=IGNORE, eps=EPS)
    out_sum = jax.block_until_ready(out_sum)
    ref_sum = _reference_focal_loss(x, target, class_weights, GAMMA, IGNORE, EPS,
                                    reduction="sum")
    assert jnp.allclose(out_sum, ref_sum, rtol=1e-4, atol=1e-3), (out_sum, ref_sum)

    # 4) 'none' reduction, no class weights, non-integer gamma (pow path),
    #    lane-dense per-sample output
    out_none = focal_loss(x, target, None, gamma=1.5, reduction="none",
                          ignore_index=IGNORE, eps=EPS)
    out_none = jax.block_until_ready(out_none)
    ref_none = _reference_focal_loss(x, target, None, 1.5, IGNORE, EPS,
                                     reduction="none")
    assert jnp.allclose(out_none, ref_none, rtol=1e-5, atol=1e-6)

    # 5) bf16 probabilities (halved pt traffic; kernel casts to f32 in-VMEM)
    out_bf16 = focal_loss(x.astype(jnp.bfloat16), target, class_weights,
                          gamma=GAMMA, reduction="mean",
                          ignore_index=IGNORE, eps=EPS)
    out_bf16 = jax.block_until_ready(out_bf16)
    assert jnp.allclose(out_bf16, ref, rtol=5e-2), (out_bf16, ref)

    # 6) binary case: x has no class dim -> implicit [1-x, x] stacking
    x_bin = jax.nn.sigmoid(jax.random.normal(k5, (B, S), jnp.float32))
    tgt_bin = jax.random.randint(k6, (B, S), 0, 2, jnp.int32)
    out_bin = focal_loss(x_bin, tgt_bin, None, gamma=GAMMA, reduction="mean",
                         ignore_index=IGNORE, eps=EPS)
    out_bin = jax.block_until_ready(out_bin)
    ref_bin = _reference_focal_loss(jnp.stack([1.0 - x_bin, x_bin], axis=-1),
                                    tgt_bin, None, GAMMA, IGNORE, EPS,
                                    reduction="mean")
    assert jnp.allclose(out_bin, ref_bin, rtol=1e-5, atol=1e-5), (out_bin, ref_bin)

    print("KERNEL_OK")
</pallas_src>

<mosaic_0001>
module attributes {stable_mosaic.version = 11 : i64} {
  func.func @_focal_reduce_kernel(%arg0: i32, %arg1: memref<8x128xf32, #tpu.memory_space<vmem>>, %arg2: memref<8x128xf32, #tpu.memory_space<vmem>>, %arg3: memref<1x1x128xf32, #tpu.memory_space<vmem>>) attributes {dimension_semantics = [#tpu.dimension_semantics<parallel>], iteration_bounds = array<i64: 1>, scalar_prefetch = 0 : i64, scratch_operands = 0 : i64, tpu.core_type = #tpu.core_type<tc>, window_params = [{transform_indices = @transform_0, window_bounds = array<i64: 8, 128>}, {transform_indices = @transform_1, window_bounds = array<i64: 8, 128>}, {transform_indices = @transform_2, window_bounds = array<i64: 1, 1, 128>}]} {
    %c0 = arith.constant 0 : index
    %c0_0 = arith.constant 0 : index
    %0 = vector.load %arg1[%c0, %c0_0] : memref<8x128xf32, #tpu.memory_space<vmem>>, vector<8x128xf32>
    %c0_1 = arith.constant 0 : index
    %c0_2 = arith.constant 0 : index
    %1 = vector.load %arg2[%c0_1, %c0_2] : memref<8x128xf32, #tpu.memory_space<vmem>>, vector<8x128xf32>
    %cst = arith.constant 1.000000e+00 : f32
    %2 = vector.broadcast %cst : f32 to vector<8x128xf32>
    %3 = arith.subf %2, %0 : vector<8x128xf32>
    %cst_3 = arith.constant 0.000000e+00 : f32
    %4 = vector.broadcast %cst_3 : f32 to vector<8x128xf32>
    %5 = arith.maximumf %3, %4 : vector<8x128xf32>
    %cst_4 = arith.constant 1.000000e-16 : f32
    %6 = vector.broadcast %cst_4 : f32 to vector<8x128xf32>
    %7 = arith.addf %6, %0 : vector<8x128xf32>
    %8 = math.log %7 : vector<8x128xf32>
    %cst_5 = arith.constant 0.000000e+00 : f32
    %9 = vector.broadcast %cst_5 : f32 to vector<8x128xf32>
    %10 = arith.subf %9, %8 : vector<8x128xf32>
    %11 = arith.mulf %5, %5 : vector<8x128xf32>
    %12 = arith.mulf %1, %11 : vector<8x128xf32>
    %13 = arith.mulf %12, %10 : vector<8x128xf32>
    %14 = vector.shape_cast %13 : vector<8x128xf32> to vector<1x8x128xf32>
    %cst_6 = arith.constant dense<0.000000e+00> : vector<1xf32>
    %15 = vector.multi_reduction <add>, %14, %cst_6 [1, 2] : vector<1x8x128xf32> to vector<1xf32>
    %16 = vector.shape_cast %15 : vector<1xf32> to vector<1x1x1xf32>
    %17 = vector.extract %16[0, 0, 0] : f32 from vector<1x1x1xf32>
    %18 = vector.shape_cast %1 : vector<8x128xf32> to vector<1x8x128xf32>
    %cst_7 = arith.constant dense<0.000000e+00> : vector<1xf32>
    %19 = vector.multi_reduction <add>, %18, %cst_7 [1, 2] : vector<1x8x128xf32> to vector<1xf32>
    %20 = vector.shape_cast %19 : vector<1xf32> to vector<1x1x1xf32>
    %21 = vector.extract %20[0, 0, 0] : f32 from vector<1x1x1xf32>
    %22 = tpu.iota {dimensions = array<i32: 2>} : vector<1x1x128xi32>
    %c0_i32 = arith.constant 0 : i32
    %23 = vector.broadcast %c0_i32 : i32 to vector<1x1x128xi32>
    %24 = arith.cmpi eq, %22, %23 : vector<1x1x128xi32>
    %c1_i32 = arith.constant 1 : i32
    %25 = vector.broadcast %c1_i32 : i32 to vector<1x1x128xi32>
    %26 = arith.cmpi eq, %22, %25 : vector<1x1x128xi32>
    %cst_8 = arith.constant 0.000000e+00 : f32
    %27 = vector.broadcast %21 : f32 to vector<1x1x128xf32>
    %28 = vector.broadcast %cst_8 : f32 to vector<1x1x128xf32>
    %29 = arith.select %26, %27, %28 : vector<1x1x128xi1>, vector<1x1x128xf32>
    %30 = vector.broadcast %17 : f32 to vector<1x1x128xf32>
    %31 = arith.select %24, %30, %29 : vector<1x1x128xi1>, vector<1x1x128xf32>
    %c0_9 = arith.constant 0 : index
    %c0_10 = arith.constant 0 : index
    %c0_11 = arith.constant 0 : index
    %32 = vector.load %arg3[%c0_9, %c0_10, %c0_11] : memref<1x1x128xf32, #tpu.memory_space<vmem>>, vector<1x1x128xf32>
    tpu.vector_store %arg3[%c0_9, %c0_10, %c0_11], %31 {strides = array<i32>} : memref<1x1x128xf32, #tpu.memory_space<vmem>>, vector<1x1x128xf32>,
    return
  }
  func.func @transform_0(%arg0: i32) -> (i32, i32) {
    %c0_i32 = arith.constant 0 : i32
    %c0_i32_0 = arith.constant 0 : i32
    return %arg0, %c0_i32 : i32, i32
  }
  func.func @transform_1(%arg0: i32) -> (i32, i32) {
    %c0_i32 = arith.constant 0 : i32
    %c0_i32_0 = arith.constant 0 : i32
    return %arg0, %c0_i32 : i32, i32
  }
  func.func @transform_2(%arg0: i32) -> (i32, i32, i32) {
    %c0_i32 = arith.constant 0 : i32
    %c0_i32_0 = arith.constant 0 : i32
    %c0_i32_1 = arith.constant 0 : i32
    return %arg0, %c0_i32, %c0_i32_0 : i32, i32, i32
  }
}

</mosaic_0001>

<bundles_post_ra>
// kernel: tpu_custom_call.1
= control target key start
LH: loop header
LB: loop body
LE: loop exit
PB: predicated region body
PF: predicated region fallthrough
CT: control target
= control target key end

     0   :  { %7 = vsyncpa [#allocation3], 0  ;;  %s225_s0 = inlined_call_operand.hbm [shape: f32[8,128], index: 0, kind: input, shape index: {}]   ;;  %s226_s1 = inlined_call_operand.hbm [shape: f32[8,128], index: 1, kind: input, shape index: {}]   ;;  %s227_s2 = inlined_call_operand.hbm [shape: f32[1,1,128], index: 2, kind: output, shape index: {}]  }
   0x1   :  { %8 = vsyncpa [#allocation6], 0 }
   0x2   :  { %9 = vsyncpa [#allocation4], 0  ;;  %s171_s9 = smov [#allocation2]   ;;  %s172_s11 = smov [#allocation5]  }
   0x3   :  { %s16_s10 = sshll.u32 %s171_s9, 4  ;;  %s26_s12 = sshll.u32 %s172_s11, 4  ;;  %s17_s10 = int_to_ptr.vmem [resolvable:$true] %s16_s10  ;;  %s27_s12 = int_to_ptr.vmem [resolvable:$true] %s26_s12 }
   0x4   :  { %s99_s15 = scalar_lea.hbm %s225_s0, 128 }
   0x5   :  { %p100_p0 = scmp.ne.s32.totalorder %s225_s0, %s99_s15  ;;  %p103_p1 = scmp.lt.u32.totalorder %s99_s15, %s225_s0 }
   0x7   :  { %p105_p2 = pnand %p103_p1, %p100_p0 }
   0x9   :  { %108 = shalt.err (!%p105_p2)
}
   0xa   :  { %s109_s20 = scalar_lea.vmem %s17_s10, 128  ;;  %p114_p4 = scmp.lt.s32.totalorder %s17_s10, %s17_s10 }
   0xb   :  { %p110_p3 = scmp.ne.s32.totalorder %s17_s10, %s109_s20  ;;  %p115_p5 = scmp.lt.s32.totalorder %s109_s20, %s109_s20 }
   0xd   :  { %p116_p6 = por %p115_p5, %p114_p4 }
   0xf   :  { %p117_p7 = pnand %p116_p6, %p110_p3 }
  0x11   :  { %120 = shalt.err (!%p117_p7)
}
  0x12   :  { %19 = dma.hbm_to_vmem [thread:$0]  %s225_s0, 128, %s17_s10, [#allocation3]  }
  0x13   :  { %s121_s25 = scalar_lea.hbm %s226_s1, 128 }
  0x14   :  { %p122_p8 = scmp.ne.s32.totalorder %s226_s1, %s121_s25  ;;  %p125_p9 = scmp.lt.u32.totalorder %s121_s25, %s226_s1 }
  0x16   :  { %p127_p10 = pnand %p125_p9, %p122_p8 }
  0x18   :  { %130 = shalt.err (!%p127_p10)
}
  0x19   :  { %s131_s30 = scalar_lea.vmem %s27_s12, 128  ;;  %p136_p12 = scmp.lt.s32.totalorder %s27_s12, %s27_s12 }
  0x1a   :  { %p132_p11 = scmp.ne.s32.totalorder %s27_s12, %s131_s30  ;;  %p137_p13 = scmp.lt.s32.totalorder %s131_s30, %s131_s30 }
  0x1c   :  { %p138_p0 = por %p137_p13, %p136_p12 }
  0x1e   :  { %p139_p1 = pnand %p138_p0, %p132_p11 }
  0x20   :  { %142 = shalt.err (!%p139_p1)
}
  0x21   :  { %29 = dma.hbm_to_vmem [thread:$0]  %s226_s1, 128, %s27_s12, [#allocation6]  }
  0x22   :  { %165 = dma.done.wait [#allocation3], 128  }
  0x23   :  { %166 = vsyncadd [#allocation3], 4294967168 }
  0x24   :  { %167 = dma.done.wait [#allocation6], 128  }
  0x25   :  { %168 = vsyncadd [#allocation6], 4294967168  ;;  %v36_v0 = vld [vmem:[#allocation2] sm:$0xff]  ;;  %v37_v5 = vld [vmem:[#allocation5] sm:$0xff]  ;;  %v65_v25 = vlaneseq  ;;  %s173_s4 = smov [#allocation7]  }
  0x26   :  { %v40_v1 = vadd.f32 1e-16, %v36_v0  ;;  %v38_v2 = vsub.f32 1.0, %v36_v0  ;;  %s80_s5 = sshll.u32 %s173_s4, 4  ;;  %s81_s5 = int_to_ptr.vmem [resolvable:$true] %s80_s5 }
  0x27   :  { %v66_v26 = vand.u32 127, %v65_v25  ;;  %s143_s7 = scalar_lea.vmem %s81_s5, 16  ;;  %s147_s8 = scalar_lea.vmem %s81_s5, 32 }
  0x28   :  { %97 = vlog2.f32 %v40_v1  ;;  %v39_v3 = vmax.f32 %v38_v2, 0.0  ;;  %p144_p2 = scmp.ne.s32.totalorder %s81_s5, %s143_s7  ;;  %p148_p3 = scmp.lt.s32.totalorder %s81_s5, %s81_s5 }
  0x29   :  { %vm68_vm0 = vcmp.eq.s32.totalorder %v66_v26, 1  ;;  %vm67_vm1 = vcmp.eq.s32.totalorder %v66_v26, 0  ;;  %p149_p4 = scmp.lt.s32.totalorder %s147_s8, %s143_s7 }
  0x2a   :  { %v44_v4 = vmul.f32 %v39_v3, %v39_v3 }
  0x2b   :  { %p150_p5 = por %p149_p4, %p148_p3 }
  0x2c   :  { %v45_v8 = vmul.f32 %v44_v4, %v37_v5 }
  0x2d   :  { %p151_p6 = pnand %p150_p5, %p144_p2 }
  0x32   :  { %v98_v6 = vpop.eup %97 }
  0x33   :  { %v42_v7 = vmul.f32 0.6931472, %v98_v6 }
  0x35   :  { %v43_v9 = vsub.f32 0.0, %v42_v7 }
  0x37   :  { %v46_v10 = vmul.f32 %v45_v8, %v43_v9 }
  0x39   :  { %47 = vadd.xlane.f32.xlu0 %v46_v10 }
  0x3d   :  { %56 = vadd.xlane.f32.xlu0 %v37_v5 }
  0xc6   :  { %v48_v11 = vpop.xlane.xlu0 %47 }
  0xc7   :  { %v49_v12 = vrot.slane %v48_v11, 4 }
  0xc9   :  { %v50_v13 = vadd.f32 %v49_v12, %v48_v11 }
  0xca   :  { %v57_v14 = vpop.xlane.xlu0 %56 }
  0xcb   :  { %v51_v15 = vrot.slane %v50_v13, 2  ;;  %v58_v16 = vrot.slane %v57_v14, 4 }
  0xcd   :  { %v59_v17 = vadd.f32 %v58_v16, %v57_v14  ;;  %v52_v18 = vadd.f32 %v51_v15, %v50_v13 }
  0xcf   :  { %v60_v19 = vrot.slane %v59_v17, 2  ;;  %v53_v20 = vrot.slane %v52_v18, 1 }
  0xd1   :  { %v61_v21 = vadd.f32 %v60_v19, %v59_v17  ;;  %v54_v22 = vadd.f32 %v53_v20, %v52_v18 }
  0xd3   :  { %90 = vpush %v54_v22  ;;  %v62_v23 = vrot.slane %v61_v21, 1 }
  0xd5   :  { %v63_v24 = vadd.f32 %v62_v23, %v61_v21 }
  0xd7   :  { %92 = vpush %v63_v24 }
 0x104   :  { %s91_s1 = spop %90 }
 0x105   :  { %v71_v28 = vstv %s91_s1 }
 0x108   :  { %s93_s6 = spop %92 }
 0x109   :  { %v69_v27 = vstv %s93_s6 }
 0x10a   :  { %v70_v29 = vsel %vm68_vm0, %v69_v27, 0.0 }
 0x10b   :  { %v72_v30 = vsel %vm67_vm1, %v71_v28, %v70_v29 }
 0x10c   :  { %73 = vst [vmem:[#allocation7] sm:$0x1] %v72_v30 }
 0x10d   :  { %154 = shalt.err (!%p151_p6)
}
 0x10e   :  { %s155_s11 = scalar_lea.hbm %s227_s2, 16 }
 0x10f   :  { %p156_p7 = scmp.ne.s32.totalorder %s227_s2, %s155_s11  ;;  %p159_p8 = scmp.lt.u32.totalorder %s155_s11, %s227_s2 }
 0x111   :  { %p161_p9 = pnand %p159_p8, %p156_p7 }
 0x113   :  { %164 = shalt.err (!%p161_p9)
}
 0x114   :  { %83 = dma.vmem_to_hbm [thread:$0]  %s81_s5, 16, %s227_s2, [#allocation4]  }
 0x115   :  { %169 = dma.done.wait [#allocation4], 16  }
 0x116   :  { %170 = vsyncadd [#allocation4], 4294967280 }
 0x117   :  { %87 = vsyncpa [#allocation3], 1 }
 0x118   :  { %88 = vsyncpa [#allocation6], 1 }
 0x119   :  { %89 = vsyncpa [#allocation4], 1 }

</bundles_post_ra>
